<compile_context>
chip_gen: v6e
topology: v6e:2x2x1
jax: 0.10.0
libtpu: 0.0.40
codegen_flags: <defaults>
</compile_context>

<pallas_src>
import math
import functools

import jax
import jax.numpy as jnp
from jax.experimental import pallas as pl
from jax.experimental.pallas import tpu as pltpu


# ------------------------- layout constants -------------------------

N_SCALAR = 10          # number of per-row scalar outputs packed into the slab
SHARED_COL = 16        # column offset of shared_h inside the output slab
_SCALAR_NAMES = (
    "p_prpsy_logit", "p_estr", "p_escr", "tau_logit", "mu1_logit",
    "mu0_logit", "p_prpsy", "p_mu1", "p_mu0", "uplift",
)


def _rup(x, m):
    return ((x + m - 1) // m) * m


# -------------- math helpers (used by kernel AND reference) --------------

def _elu(v):
    # ELU(alpha=1): x if x>0 else exp(x)-1 (clamp arg of exp to avoid inf on the dead branch)
    return jnp.where(v > 0, v, jnp.exp(jnp.minimum(v, 0.0)) - 1.0)


def _sigmoid(v):
    # Exact sigmoid: the scalar columns are tiny, so EUP cost is negligible and this keeps the
    # kernel numerically matched to the reference.
    return 1.0 / (1.0 + jnp.exp(-v))


# ------------------------------ kernel ------------------------------

def descn_kernel(x_ref, w_ref, b_ref, out_ref, *, layout):
    """layout: static tuple of (row_offset, K, N) for the 7 fused linear layers inside w_ref."""
    f32 = jnp.float32
    tb, slab_w = out_ref.shape

    def layer(a, idx, activate=True):
        off, k, n = layout[idx]
        w = w_ref[off:off + k, :n]                 # static, tile-aligned slice of the weight slab
        b = b_ref[idx:idx + 1, :n]                 # (1, n) f32 bias row
        y = jnp.dot(a.astype(w_ref.dtype), w, preferred_element_type=f32) + b
        return _elu(y) if activate else y

    x = x_ref[...].astype(f32)

    # ---- ShareNetwork: Linear->ELU (x3); Dropout = identity at inference ----
    h = layer(x, 0)
    h = layer(h, 1)
    # Layer 2's weights are packed so shared_h lands directly at columns
    # [SHARED_COL, SHARED_COL + base_dim) of a lane-dense (tb, slab_w) activation; every other
    # column is exactly zero (zero weights/bias -> ELU(0)=0).
    shared = layer(h, 2)
    # TODO(synk): cfg['normalization']=='divide' (L2 row-normalize with safe_sqrt) not implemented;
    # DESCN default is 'none', so shared_h == shared.

    # ---- 4 heads fused: wide layer 0, two block-diagonal layers, packed logit layer ----
    hh = layer(shared, 3)
    hh = layer(hh, 4)
    hh = layer(hh, 5)
    logits = layer(hh, 6, activate=False)          # (tb, 128); cols 0..3 = prpsy, mu1, mu0, tau

    prpsy_logit = logits[:, 0:1]
    mu1_logit = logits[:, 1:2]
    mu0_logit = logits[:, 2:3]
    tau_logit = logits[:, 3:4]

    p_prpsy = jnp.clip(_sigmoid(prpsy_logit), 0.001, 0.999)
    p_mu1 = _sigmoid(mu1_logit)
    p_mu0 = _sigmoid(mu0_logit)
    p_estr = p_prpsy * p_mu1
    p_escr = (1.0 - p_prpsy) * p_mu0
    uplift = p_mu1 - p_mu0

    scalars = (prpsy_logit, p_estr, p_escr, tau_logit, mu1_logit, mu0_logit,
               p_prpsy, p_mu1, p_mu0, uplift)

    # Assemble the lane-dense output slab in registers: shared already occupies its final
    # columns (and is zero in columns < SHARED_COL), so only overlay the 10 scalar columns.
    col = jax.lax.broadcasted_iota(jnp.int32, (tb, slab_w), 1)
    out = shared
    for i, v in enumerate(scalars):
        out = jnp.where(col == i, v, out)
    out_ref[...] = out                             # single full-width store / single output DMA


# ------------------------ parameter init / packing ------------------------

def init_descn_params(key, input_dim, share_dim, base_dim, dtype=jnp.float32):
    """Deterministic init mirroring init_weights: W ~ N(0, 1/sqrt(fan_in)), b = 0.
    Weights stored as [in, out] (already transposed vs. torch)."""
    keys = jax.random.split(key, 32)
    ki = iter(range(32))

    def lin(k, fan_in, fan_out):
        std = 1.0 / math.sqrt(fan_in)
        return (jax.random.normal(k, (fan_in, fan_out), dtype) * std).astype(dtype)

    # ShareNetwork
    ws0 = lin(keys[next(ki)], input_dim, share_dim); bs0 = jnp.zeros((1, share_dim), dtype)
    ws1 = lin(keys[next(ki)], share_dim, share_dim); bs1 = jnp.zeros((1, share_dim), dtype)
    ws2 = lin(keys[next(ki)], share_dim, base_dim);  bs2 = jnp.zeros((1, base_dim), dtype)

    # 4 heads in order (prpsy, mu1, mu0, tau): 3 base linears + 1 logit linear each
    wh = jnp.stack([
        jnp.stack([lin(keys[next(ki)], base_dim, base_dim) for _ in range(3)], axis=0)
        for _ in range(4)
    ], axis=0)                                            # (4, 3, base_dim, base_dim)
    bh = jnp.zeros((4, 3, 1, base_dim), dtype)
    wl = jnp.stack([lin(keys[next(ki)], base_dim, 1) for _ in range(4)], axis=0)  # (4, base_dim, 1)
    bl = jnp.zeros((4, 1, 1), dtype)

    return dict(ws0=ws0, bs0=bs0, ws1=ws1, bs1=bs1, ws2=ws2, bs2=bs2,
                wh=wh, bh=bh, wl=wl, bl=bl)


def pack_params(p, compute_dtype=jnp.float32):
    """Host-side repacking:
       * zero-pad every linear to lane-dense widths,
       * fuse the 4 heads into wide / block-diagonal / packed-logit weights,
       * shift ws2's output columns so shared_h lands directly in its final slab position,
       * concatenate all 7 weight matrices (128-row-aligned) into ONE slab and all 7 biases
         into ONE (8, Nmax) slab.
    Returns (packed_arrays, layout) where layout is a static tuple of (row_off, K, N)."""
    f32 = jnp.float32
    input_dim, share_dim = p["ws0"].shape
    base_dim = p["ws2"].shape[1]
    assert SHARED_COL >= N_SCALAR

    s1 = _rup(share_dim, 128)                 # padded ShareNetwork hidden width
    slab_w = _rup(SHARED_COL + base_dim, 128) # padded shared_h width == output slab width
    hfd = _rup(4 * base_dim, 128)             # fused 4-head hidden width (=128 for base_dim<=32)
    lfd = 128                                 # padded logit width (cols 0..3 real)

    def pad2(w, rows, cols, r0=0, c0=0):
        buf = jnp.zeros((rows, cols), f32)
        return buf.at[r0:r0 + w.shape[0], c0:c0 + w.shape[1]].set(w.astype(f32))

    ws0 = pad2(p["ws0"], input_dim, s1)
    ws1 = pad2(p["ws1"], s1, s1)
    # Shift shared_h into columns [SHARED_COL, SHARED_COL + base_dim) of the padded activation.
    ws2 = pad2(p["ws2"], s1, slab_w, c0=SHARED_COL)

    wh0 = jnp.zeros((slab_w, hfd), f32)
    wh1 = jnp.zeros((hfd, hfd), f32)
    wh2 = jnp.zeros((hfd, hfd), f32)
    wl = jnp.zeros((hfd, lfd), f32)

    bs0 = pad2(p["bs0"], 1, s1)
    bs1 = pad2(p["bs1"], 1, s1)
    bs2 = pad2(p["bs2"], 1, slab_w, c0=SHARED_COL)
    bh0 = jnp.zeros((1, hfd), f32)
    bh1 = jnp.zeros((1, hfd), f32)
    bh2 = jnp.zeros((1, hfd), f32)
    bl = jnp.zeros((1, lfd), f32)

    for h in range(4):
        c0, c1 = h * base_dim, (h + 1) * base_dim
        # layer 0: rows aligned with shifted shared_h columns, concat across heads
        wh0 = wh0.at[SHARED_COL:SHARED_COL + base_dim, c0:c1].set(p["wh"][h, 0].astype(f32))
        bh0 = bh0.at[0, c0:c1].set(p["bh"][h, 0, 0].astype(f32))
        # layers 1, 2: block-diagonal
        wh1 = wh1.at[c0:c1, c0:c1].set(p["wh"][h, 1].astype(f32))
        bh1 = bh1.at[0, c0:c1].set(p["bh"][h, 1, 0].astype(f32))
        wh2 = wh2.at[c0:c1, c0:c1].set(p["wh"][h, 2].astype(f32))
        bh2 = bh2.at[0, c0:c1].set(p["bh"][h, 2, 0].astype(f32))
        # logit layers: head h -> column h
        wl = wl.at[c0:c1, h].set(p["wl"][h, :, 0].astype(f32))
        bl = bl.at[0, h].set(p["bl"][h, 0, 0].astype(f32))

    w_blocks = [ws0, ws1, ws2, wh0, wh1, wh2, wl]
    b_blocks = [bs0, bs1, bs2, bh0, bh1, bh2, bl]
    n_max = max(w.shape[1] for w in w_blocks)

    # Row offsets aligned to 128 so every in-kernel slice is sublane-tile-aligned for any dtype.
    layout = []
    off = 0
    for w in w_blocks:
        k, n = w.shape
        layout.append((off, k, n))
        off = _rup(off + k, 128)
    total_rows = _rup(off, 8)

    w_all = jnp.zeros((total_rows, n_max), f32)
    for (o, k, n), w in zip(layout, w_blocks):
        w_all = w_all.at[o:o + k, :n].set(w)

    b_all = jnp.zeros((_rup(len(b_blocks), 8), n_max), f32)
    for i, b in enumerate(b_blocks):
        b_all = b_all.at[i, :b.shape[1]].set(b[0])

    packed = dict(w_all=w_all.astype(compute_dtype), b_all=b_all)
    return packed, tuple(layout)


# ----------------------------- wrapper ------------------------------

@functools.partial(jax.jit, static_argnames=("layout", "base_dim"))
def descn_forward(x, packed, *, layout, base_dim):
    B, input_dim = x.shape
    f32 = jnp.float32
    slab_w = _rup(SHARED_COL + base_dim, 128)

    # Balanced batch tiling: cap tiles at 512 rows, round rows to 8 sublanes, minimal padding.
    max_rows = 512
    n_tiles = pl.cdiv(B, max_rows)
    tile_rows = _rup(pl.cdiv(B, n_tiles), 8)
    b_pad = tile_rows * n_tiles
    if b_pad != B:
        x = jnp.pad(x, ((0, b_pad - B), (0, 0)))

    w_all, b_all = packed["w_all"], packed["b_all"]
    kernel = functools.partial(descn_kernel, layout=layout)

    slab = pl.pallas_call(
        kernel,
        out_shape=jax.ShapeDtypeStruct((b_pad, slab_w), f32),
        grid=(n_tiles,),
        in_specs=[
            pl.BlockSpec((tile_rows, input_dim), lambda i: (i, 0)),   # x blocked over rows
            pl.BlockSpec(w_all.shape, lambda i: (0, 0)),              # weight slab resident
            pl.BlockSpec(b_all.shape, lambda i: (0, 0)),              # bias slab resident
        ],
        out_specs=pl.BlockSpec((tile_rows, slab_w), lambda i: (i, 0)),
        compiler_params=pltpu.CompilerParams(
            dimension_semantics=("parallel",)),
    )(x, w_all, b_all)

    slab = slab[:B]
    out = {name: slab[:, i:i + 1] for i, name in enumerate(_SCALAR_NAMES)}
    out["shared_h"] = slab[:, SHARED_COL:SHARED_COL + base_dim]
    return out


# ------------------------ pure-JAX reference ------------------------

def descn_forward_ref(x, p, compute_dtype=jnp.float32):
    prec = jax.lax.Precision.HIGHEST
    cd = compute_dtype

    def lin(a, w, b):
        y = jnp.dot(a.astype(cd), w.astype(cd),
                    preferred_element_type=jnp.float32, precision=prec)
        return y + b.astype(jnp.float32)

    h = _elu(lin(x, p["ws0"], p["bs0"]))
    h = _elu(lin(h, p["ws1"], p["bs1"]))
    shared = _elu(lin(h, p["ws2"], p["bs2"]))

    logits = []
    for head in range(4):
        hh = shared
        for layer in range(3):
            hh = _elu(lin(hh, p["wh"][head, layer], p["bh"][head, layer]))
        logits.append(lin(hh, p["wl"][head], p["bl"][head]))
    prpsy_logit, mu1_logit, mu0_logit, tau_logit = logits
    p_prpsy = jnp.clip(_sigmoid(prpsy_logit), 0.001, 0.999)
    p_mu1, p_mu0 = _sigmoid(mu1_logit), _sigmoid(mu0_logit)
    return dict(p_prpsy_logit=prpsy_logit, p_estr=p_prpsy * p_mu1,
                p_escr=(1 - p_prpsy) * p_mu0, tau_logit=tau_logit,
                mu1_logit=mu1_logit, mu0_logit=mu0_logit, p_prpsy=p_prpsy,
                p_mu1=p_mu1, p_mu0=p_mu0, shared_h=shared, uplift=p_mu1 - p_mu0)


# ------------------------------- main --------------------------------

if __name__ == "__main__":
    B, INPUT_DIM, SHARE_DIM, BASE_DIM = 8, 32, 64, 32

    key = jax.random.PRNGKey(0)
    k_x, k_p = jax.random.split(key)
    x = jax.random.normal(k_x, (B, INPUT_DIM), jnp.float32)
    params = init_descn_params(k_p, INPUT_DIM, SHARE_DIM, BASE_DIM)

    # ---- f32 path: exact forward-pass semantics check ----
    packed_f32, layout = pack_params(params, compute_dtype=jnp.float32)
    outs = descn_forward(x, packed_f32, layout=layout, base_dim=BASE_DIM)
    jax.block_until_ready(outs)
    ref = descn_forward_ref(x, params, compute_dtype=jnp.float32)
    for name in ref:
        assert outs[name].shape == ref[name].shape, f"shape mismatch for {name}"
        assert jnp.allclose(outs[name], ref[name], atol=1e-4, rtol=1e-4), \
            f"value mismatch for {name}"

    # ---- bf16 matmul path (recommended on v6e/v7x): accumulate f32, elementwise in f32 ----
    packed_bf16, layout_bf16 = pack_params(params, compute_dtype=jnp.bfloat16)
    outs_bf16 = descn_forward(x, packed_bf16, layout=layout_bf16, base_dim=BASE_DIM)
    jax.block_until_ready(outs_bf16)
    ref_bf16 = descn_forward_ref(x, params, compute_dtype=jnp.bfloat16)
    for name in ref_bf16:
        assert outs_bf16[name].shape == ref_bf16[name].shape, f"bf16 shape mismatch for {name}"
        assert jnp.allclose(outs_bf16[name], ref_bf16[name], atol=1e-2, rtol=1e-2), \
            f"bf16 value mismatch for {name}"

    print("KERNEL_OK")
</pallas_src>

<mosaic_0001>
module attributes {stable_mosaic.version = 11 : i64} {
  func.func @descn_kernel(%arg0: i32, %arg1: memref<8x32xf32, #tpu.memory_space<vmem>>, %arg2: memref<896x128xf32, #tpu.memory_space<vmem>>, %arg3: memref<8x128xf32, #tpu.memory_space<vmem>>, %arg4: memref<8x128xf32, #tpu.memory_space<vmem>>) attributes {dimension_semantics = [#tpu.dimension_semantics<parallel>], iteration_bounds = array<i64: 1>, scalar_prefetch = 0 : i64, scratch_operands = 0 : i64, tpu.core_type = #tpu.core_type<tc>, window_params = [{transform_indices = @transform_0, window_bounds = array<i64: 8, 32>}, {pipeline_mode = #tpu.pipeline_mode<synchronous>, transform_indices = @transform_1, window_bounds = array<i64: 896, 128>}, {pipeline_mode = #tpu.pipeline_mode<synchronous>, transform_indices = @transform_2, window_bounds = array<i64: 8, 128>}, {transform_indices = @transform_3, window_bounds = array<i64: 8, 128>}]} {
    %c0 = arith.constant 0 : index
    %c0_0 = arith.constant 0 : index
    %0 = vector.load %arg1[%c0, %c0_0] : memref<8x32xf32, #tpu.memory_space<vmem>>, vector<8x32xf32>
    %c0_1 = arith.constant 0 : index
    %c0_2 = arith.constant 0 : index
    %1 = vector.load %arg2[%c0_1, %c0_2] : memref<896x128xf32, #tpu.memory_space<vmem>>, vector<32x128xf32>
    %c0_3 = arith.constant 0 : index
    %c0_4 = arith.constant 0 : index
    %2 = vector.load %arg3[%c0_3, %c0_4] : memref<8x128xf32, #tpu.memory_space<vmem>>, vector<1x128xf32>
    %cst = arith.constant dense<0.000000e+00> : vector<8x128xf32>
    %3 = tpu.matmul %0, %1, %cst {dimension_numbers = #tpu.dot_dimension_numbers<[1], [0], [0], [1], [0, 0, 1, 1], [], []>} : vector<8x32xf32>, vector<32x128xf32>, vector<8x128xf32> -> vector<8x128xf32>
    %4 = vector.broadcast %2 : vector<1x128xf32> to vector<8x128xf32>
    %5 = arith.addf %3, %4 : vector<8x128xf32>
    %cst_5 = arith.constant 0.000000e+00 : f32
    %6 = vector.broadcast %cst_5 : f32 to vector<8x128xf32>
    %7 = arith.cmpf ogt, %5, %6 : vector<8x128xf32>
    %cst_6 = arith.constant 0.000000e+00 : f32
    %8 = vector.broadcast %cst_6 : f32 to vector<8x128xf32>
    %9 = arith.minimumf %5, %8 : vector<8x128xf32>
    %10 = math.exp %9 : vector<8x128xf32>
    %cst_7 = arith.constant 1.000000e+00 : f32
    %11 = vector.broadcast %cst_7 : f32 to vector<8x128xf32>
    %12 = arith.subf %10, %11 : vector<8x128xf32>
    %13 = arith.select %7, %5, %12 : vector<8x128xi1>, vector<8x128xf32>
    %c128 = arith.constant 128 : index
    %c0_8 = arith.constant 0 : index
    %14 = vector.load %arg2[%c128, %c0_8] : memref<896x128xf32, #tpu.memory_space<vmem>>, vector<128x128xf32>
    %c1 = arith.constant 1 : index
    %c0_9 = arith.constant 0 : index
    %15 = vector.load %arg3[%c1, %c0_9] : memref<8x128xf32, #tpu.memory_space<vmem>>, vector<1x128xf32>
    %cst_10 = arith.constant dense<0.000000e+00> : vector<8x128xf32>
    %16 = tpu.matmul %13, %14, %cst_10 {dimension_numbers = #tpu.dot_dimension_numbers<[1], [0], [0], [1], [0, 0, 1, 1], [], []>} : vector<8x128xf32>, vector<128x128xf32>, vector<8x128xf32> -> vector<8x128xf32>
    %17 = vector.broadcast %15 : vector<1x128xf32> to vector<8x128xf32>
    %18 = arith.addf %16, %17 : vector<8x128xf32>
    %cst_11 = arith.constant 0.000000e+00 : f32
    %19 = vector.broadcast %cst_11 : f32 to vector<8x128xf32>
    %20 = arith.cmpf ogt, %18, %19 : vector<8x128xf32>
    %cst_12 = arith.constant 0.000000e+00 : f32
    %21 = vector.broadcast %cst_12 : f32 to vector<8x128xf32>
    %22 = arith.minimumf %18, %21 : vector<8x128xf32>
    %23 = math.exp %22 : vector<8x128xf32>
    %cst_13 = arith.constant 1.000000e+00 : f32
    %24 = vector.broadcast %cst_13 : f32 to vector<8x128xf32>
    %25 = arith.subf %23, %24 : vector<8x128xf32>
    %26 = arith.select %20, %18, %25 : vector<8x128xi1>, vector<8x128xf32>
    %c256 = arith.constant 256 : index
    %c0_14 = arith.constant 0 : index
    %27 = vector.load %arg2[%c256, %c0_14] : memref<896x128xf32, #tpu.memory_space<vmem>>, vector<128x128xf32>
    %c2 = arith.constant 2 : index
    %c0_15 = arith.constant 0 : index
    %28 = vector.load %arg3[%c2, %c0_15] : memref<8x128xf32, #tpu.memory_space<vmem>>, vector<1x128xf32>
    %cst_16 = arith.constant dense<0.000000e+00> : vector<8x128xf32>
    %29 = tpu.matmul %26, %27, %cst_16 {dimension_numbers = #tpu.dot_dimension_numbers<[1], [0], [0], [1], [0, 0, 1, 1], [], []>} : vector<8x128xf32>, vector<128x128xf32>, vector<8x128xf32> -> vector<8x128xf32>
    %30 = vector.broadcast %28 : vector<1x128xf32> to vector<8x128xf32>
    %31 = arith.addf %29, %30 : vector<8x128xf32>
    %cst_17 = arith.constant 0.000000e+00 : f32
    %32 = vector.broadcast %cst_17 : f32 to vector<8x128xf32>
    %33 = arith.cmpf ogt, %31, %32 : vector<8x128xf32>
    %cst_18 = arith.constant 0.000000e+00 : f32
    %34 = vector.broadcast %cst_18 : f32 to vector<8x128xf32>
    %35 = arith.minimumf %31, %34 : vector<8x128xf32>
    %36 = math.exp %35 : vector<8x128xf32>
    %cst_19 = arith.constant 1.000000e+00 : f32
    %37 = vector.broadcast %cst_19 : f32 to vector<8x128xf32>
    %38 = arith.subf %36, %37 : vector<8x128xf32>
    %39 = arith.select %33, %31, %38 : vector<8x128xi1>, vector<8x128xf32>
    %c384 = arith.constant 384 : index
    %c0_20 = arith.constant 0 : index
    %40 = vector.load %arg2[%c384, %c0_20] : memref<896x128xf32, #tpu.memory_space<vmem>>, vector<128x128xf32>
    %c3 = arith.constant 3 : index
    %c0_21 = arith.constant 0 : index
    %41 = vector.load %arg3[%c3, %c0_21] : memref<8x128xf32, #tpu.memory_space<vmem>>, vector<1x128xf32>
    %cst_22 = arith.constant dense<0.000000e+00> : vector<8x128xf32>
    %42 = tpu.matmul %39, %40, %cst_22 {dimension_numbers = #tpu.dot_dimension_numbers<[1], [0], [0], [1], [0, 0, 1, 1], [], []>} : vector<8x128xf32>, vector<128x128xf32>, vector<8x128xf32> -> vector<8x128xf32>
    %43 = vector.broadcast %41 : vector<1x128xf32> to vector<8x128xf32>
    %44 = arith.addf %42, %43 : vector<8x128xf32>
    %cst_23 = arith.constant 0.000000e+00 : f32
    %45 = vector.broadcast %cst_23 : f32 to vector<8x128xf32>
    %46 = arith.cmpf ogt, %44, %45 : vector<8x128xf32>
    %cst_24 = arith.constant 0.000000e+00 : f32
    %47 = vector.broadcast %cst_24 : f32 to vector<8x128xf32>
    %48 = arith.minimumf %44, %47 : vector<8x128xf32>
    %49 = math.exp %48 : vector<8x128xf32>
    %cst_25 = arith.constant 1.000000e+00 : f32
    %50 = vector.broadcast %cst_25 : f32 to vector<8x128xf32>
    %51 = arith.subf %49, %50 : vector<8x128xf32>
    %52 = arith.select %46, %44, %51 : vector<8x128xi1>, vector<8x128xf32>
    %c512 = arith.constant 512 : index
    %c0_26 = arith.constant 0 : index
    %53 = vector.load %arg2[%c512, %c0_26] : memref<896x128xf32, #tpu.memory_space<vmem>>, vector<128x128xf32>
    %c4 = arith.constant 4 : index
    %c0_27 = arith.constant 0 : index
    %54 = vector.load %arg3[%c4, %c0_27] : memref<8x128xf32, #tpu.memory_space<vmem>>, vector<1x128xf32>
    %cst_28 = arith.constant dense<0.000000e+00> : vector<8x128xf32>
    %55 = tpu.matmul %52, %53, %cst_28 {dimension_numbers = #tpu.dot_dimension_numbers<[1], [0], [0], [1], [0, 0, 1, 1], [], []>} : vector<8x128xf32>, vector<128x128xf32>, vector<8x128xf32> -> vector<8x128xf32>
    %56 = vector.broadcast %54 : vector<1x128xf32> to vector<8x128xf32>
    %57 = arith.addf %55, %56 : vector<8x128xf32>
    %cst_29 = arith.constant 0.000000e+00 : f32
    %58 = vector.broadcast %cst_29 : f32 to vector<8x128xf32>
    %59 = arith.cmpf ogt, %57, %58 : vector<8x128xf32>
    %cst_30 = arith.constant 0.000000e+00 : f32
    %60 = vector.broadcast %cst_30 : f32 to vector<8x128xf32>
    %61 = arith.minimumf %57, %60 : vector<8x128xf32>
    %62 = math.exp %61 : vector<8x128xf32>
    %cst_31 = arith.constant 1.000000e+00 : f32
    %63 = vector.broadcast %cst_31 : f32 to vector<8x128xf32>
    %64 = arith.subf %62, %63 : vector<8x128xf32>
    %65 = arith.select %59, %57, %64 : vector<8x128xi1>, vector<8x128xf32>
    %c640 = arith.constant 640 : index
    %c0_32 = arith.constant 0 : index
    %66 = vector.load %arg2[%c640, %c0_32] : memref<896x128xf32, #tpu.memory_space<vmem>>, vector<128x128xf32>
    %c5 = arith.constant 5 : index
    %c0_33 = arith.constant 0 : index
    %67 = vector.load %arg3[%c5, %c0_33] : memref<8x128xf32, #tpu.memory_space<vmem>>, vector<1x128xf32>
    %cst_34 = arith.constant dense<0.000000e+00> : vector<8x128xf32>
    %68 = tpu.matmul %65, %66, %cst_34 {dimension_numbers = #tpu.dot_dimension_numbers<[1], [0], [0], [1], [0, 0, 1, 1], [], []>} : vector<8x128xf32>, vector<128x128xf32>, vector<8x128xf32> -> vector<8x128xf32>
    %69 = vector.broadcast %67 : vector<1x128xf32> to vector<8x128xf32>
    %70 = arith.addf %68, %69 : vector<8x128xf32>
    %cst_35 = arith.constant 0.000000e+00 : f32
    %71 = vector.broadcast %cst_35 : f32 to vector<8x128xf32>
    %72 = arith.cmpf ogt, %70, %71 : vector<8x128xf32>
    %cst_36 = arith.constant 0.000000e+00 : f32
    %73 = vector.broadcast %cst_36 : f32 to vector<8x128xf32>
    %74 = arith.minimumf %70, %73 : vector<8x128xf32>
    %75 = math.exp %74 : vector<8x128xf32>
    %cst_37 = arith.constant 1.000000e+00 : f32
    %76 = vector.broadcast %cst_37 : f32 to vector<8x128xf32>
    %77 = arith.subf %75, %76 : vector<8x128xf32>
    %78 = arith.select %72, %70, %77 : vector<8x128xi1>, vector<8x128xf32>
    %c768 = arith.constant 768 : index
    %c0_38 = arith.constant 0 : index
    %79 = vector.load %arg2[%c768, %c0_38] : memref<896x128xf32, #tpu.memory_space<vmem>>, vector<128x128xf32>
    %c6 = arith.constant 6 : index
    %c0_39 = arith.constant 0 : index
    %80 = vector.load %arg3[%c6, %c0_39] : memref<8x128xf32, #tpu.memory_space<vmem>>, vector<1x128xf32>
    %cst_40 = arith.constant dense<0.000000e+00> : vector<8x128xf32>
    %81 = tpu.matmul %78, %79, %cst_40 {dimension_numbers = #tpu.dot_dimension_numbers<[1], [0], [0], [1], [0, 0, 1, 1], [], []>} : vector<8x128xf32>, vector<128x128xf32>, vector<8x128xf32> -> vector<8x128xf32>
    %82 = vector.broadcast %80 : vector<1x128xf32> to vector<8x128xf32>
    %83 = arith.addf %81, %82 : vector<8x128xf32>
    %84 = vector.extract_strided_slice %83 {offsets = [0, 0], sizes = [8, 1], strides = [1, 1]} : vector<8x128xf32> to vector<8x1xf32>
    %85 = vector.extract_strided_slice %83 {offsets = [0, 1], sizes = [8, 1], strides = [1, 1]} : vector<8x128xf32> to vector<8x1xf32>
    %86 = vector.extract_strided_slice %83 {offsets = [0, 2], sizes = [8, 1], strides = [1, 1]} : vector<8x128xf32> to vector<8x1xf32>
    %87 = vector.extract_strided_slice %83 {offsets = [0, 3], sizes = [8, 1], strides = [1, 1]} : vector<8x128xf32> to vector<8x1xf32>
    %cst_41 = arith.constant 0.000000e+00 : f32
    %88 = vector.broadcast %cst_41 : f32 to vector<8x1xf32>
    %89 = arith.subf %88, %84 : vector<8x1xf32>
    %90 = math.exp %89 : vector<8x1xf32>
    %cst_42 = arith.constant 1.000000e+00 : f32
    %91 = vector.broadcast %cst_42 : f32 to vector<8x1xf32>
    %92 = arith.addf %91, %90 : vector<8x1xf32>
    %cst_43 = arith.constant 1.000000e+00 : f32
    %93 = vector.broadcast %cst_43 : f32 to vector<8x1xf32>
    %94 = arith.divf %93, %92 : vector<8x1xf32>
    %cst_44 = arith.constant 1.000000e-03 : f32
    %cst_45 = arith.constant 9.990000e-01 : f32
    %95 = vector.broadcast %cst_44 : f32 to vector<8x1xf32>
    %96 = arith.maximumf %95, %94 : vector<8x1xf32>
    %97 = vector.broadcast %cst_45 : f32 to vector<8x1xf32>
    %98 = arith.minimumf %97, %96 : vector<8x1xf32>
    %cst_46 = arith.constant 0.000000e+00 : f32
    %99 = vector.broadcast %cst_46 : f32 to vector<8x1xf32>
    %100 = arith.subf %99, %85 : vector<8x1xf32>
    %101 = math.exp %100 : vector<8x1xf32>
    %cst_47 = arith.constant 1.000000e+00 : f32
    %102 = vector.broadcast %cst_47 : f32 to vector<8x1xf32>
    %103 = arith.addf %102, %101 : vector<8x1xf32>
    %cst_48 = arith.constant 1.000000e+00 : f32
    %104 = vector.broadcast %cst_48 : f32 to vector<8x1xf32>
    %105 = arith.divf %104, %103 : vector<8x1xf32>
    %cst_49 = arith.constant 0.000000e+00 : f32
    %106 = vector.broadcast %cst_49 : f32 to vector<8x1xf32>
    %107 = arith.subf %106, %86 : vector<8x1xf32>
    %108 = math.exp %107 : vector<8x1xf32>
    %cst_50 = arith.constant 1.000000e+00 : f32
    %109 = vector.broadcast %cst_50 : f32 to vector<8x1xf32>
    %110 = arith.addf %109, %108 : vector<8x1xf32>
    %cst_51 = arith.constant 1.000000e+00 : f32
    %111 = vector.broadcast %cst_51 : f32 to vector<8x1xf32>
    %112 = arith.divf %111, %110 : vector<8x1xf32>
    %113 = arith.mulf %98, %105 : vector<8x1xf32>
    %cst_52 = arith.constant 1.000000e+00 : f32
    %114 = vector.broadcast %cst_52 : f32 to vector<8x1xf32>
    %115 = arith.subf %114, %98 : vector<8x1xf32>
    %116 = arith.mulf %115, %112 : vector<8x1xf32>
    %117 = arith.subf %105, %112 : vector<8x1xf32>
    %118 = tpu.iota {dimensions = array<i32: 1>} : vector<8x128xi32>
    %c0_i32 = arith.constant 0 : i32
    %119 = vector.broadcast %c0_i32 : i32 to vector<8x128xi32>
    %120 = arith.cmpi eq, %118, %119 : vector<8x128xi32>
    %121 = vector.shape_cast %84 : vector<8x1xf32> to vector<8x1xf32>
    %122 = vector.broadcast %121 : vector<8x1xf32> to vector<8x128xf32>
    %123 = arith.select %120, %122, %39 : vector<8x128xi1>, vector<8x128xf32>
    %c1_i32 = arith.constant 1 : i32
    %124 = vector.broadcast %c1_i32 : i32 to vector<8x128xi32>
    %125 = arith.cmpi eq, %118, %124 : vector<8x128xi32>
    %126 = vector.shape_cast %113 : vector<8x1xf32> to vector<8x1xf32>
    %127 = vector.broadcast %126 : vector<8x1xf32> to vector<8x128xf32>
    %128 = arith.select %125, %127, %123 : vector<8x128xi1>, vector<8x128xf32>
    %c2_i32 = arith.constant 2 : i32
    %129 = vector.broadcast %c2_i32 : i32 to vector<8x128xi32>
    %130 = arith.cmpi eq, %118, %129 : vector<8x128xi32>
    %131 = vector.shape_cast %116 : vector<8x1xf32> to vector<8x1xf32>
    %132 = vector.broadcast %131 : vector<8x1xf32> to vector<8x128xf32>
    %133 = arith.select %130, %132, %128 : vector<8x128xi1>, vector<8x128xf32>
    %c3_i32 = arith.constant 3 : i32
    %134 = vector.broadcast %c3_i32 : i32 to vector<8x128xi32>
    %135 = arith.cmpi eq, %118, %134 : vector<8x128xi32>
    %136 = vector.shape_cast %87 : vector<8x1xf32> to vector<8x1xf32>
    %137 = vector.broadcast %136 : vector<8x1xf32> to vector<8x128xf32>
    %138 = arith.select %135, %137, %133 : vector<8x128xi1>, vector<8x128xf32>
    %c4_i32 = arith.constant 4 : i32
    %139 = vector.broadcast %c4_i32 : i32 to vector<8x128xi32>
    %140 = arith.cmpi eq, %118, %139 : vector<8x128xi32>
    %141 = vector.shape_cast %85 : vector<8x1xf32> to vector<8x1xf32>
    %142 = vector.broadcast %141 : vector<8x1xf32> to vector<8x128xf32>
    %143 = arith.select %140, %142, %138 : vector<8x128xi1>, vector<8x128xf32>
    %c5_i32 = arith.constant 5 : i32
    %144 = vector.broadcast %c5_i32 : i32 to vector<8x128xi32>
    %145 = arith.cmpi eq, %118, %144 : vector<8x128xi32>
    %146 = vector.shape_cast %86 : vector<8x1xf32> to vector<8x1xf32>
    %147 = vector.broadcast %146 : vector<8x1xf32> to vector<8x128xf32>
    %148 = arith.select %145, %147, %143 : vector<8x128xi1>, vector<8x128xf32>
    %c6_i32 = arith.constant 6 : i32
    %149 = vector.broadcast %c6_i32 : i32 to vector<8x128xi32>
    %150 = arith.cmpi eq, %118, %149 : vector<8x128xi32>
    %151 = vector.shape_cast %98 : vector<8x1xf32> to vector<8x1xf32>
    %152 = vector.broadcast %151 : vector<8x1xf32> to vector<8x128xf32>
    %153 = arith.select %150, %152, %148 : vector<8x128xi1>, vector<8x128xf32>
    %c7_i32 = arith.constant 7 : i32
    %154 = vector.broadcast %c7_i32 : i32 to vector<8x128xi32>
    %155 = arith.cmpi eq, %118, %154 : vector<8x128xi32>
    %156 = vector.shape_cast %105 : vector<8x1xf32> to vector<8x1xf32>
    %157 = vector.broadcast %156 : vector<8x1xf32> to vector<8x128xf32>
    %158 = arith.select %155, %157, %153 : vector<8x128xi1>, vector<8x128xf32>
    %c8_i32 = arith.constant 8 : i32
    %159 = vector.broadcast %c8_i32 : i32 to vector<8x128xi32>
    %160 = arith.cmpi eq, %118, %159 : vector<8x128xi32>
    %161 = vector.shape_cast %112 : vector<8x1xf32> to vector<8x1xf32>
    %162 = vector.broadcast %161 : vector<8x1xf32> to vector<8x128xf32>
    %163 = arith.select %160, %162, %158 : vector<8x128xi1>, vector<8x128xf32>
    %c9_i32 = arith.constant 9 : i32
    %164 = vector.broadcast %c9_i32 : i32 to vector<8x128xi32>
    %165 = arith.cmpi eq, %118, %164 : vector<8x128xi32>
    %166 = vector.shape_cast %117 : vector<8x1xf32> to vector<8x1xf32>
    %167 = vector.broadcast %166 : vector<8x1xf32> to vector<8x128xf32>
    %168 = arith.select %165, %167, %163 : vector<8x128xi1>, vector<8x128xf32>
    %c0_53 = arith.constant 0 : index
    %c0_54 = arith.constant 0 : index
    %169 = vector.load %arg4[%c0_53, %c0_54] : memref<8x128xf32, #tpu.memory_space<vmem>>, vector<8x128xf32>
    tpu.vector_store %arg4[%c0_53, %c0_54], %168 {strides = array<i32>} : memref<8x128xf32, #tpu.memory_space<vmem>>, vector<8x128xf32>,
    return
  }
  func.func @transform_0(%arg0: i32) -> (i32, i32) {
    %c0_i32 = arith.constant 0 : i32
    %c0_i32_0 = arith.constant 0 : i32
    return %arg0, %c0_i32 : i32, i32
  }
  func.func @transform_1(%arg0: i32) -> (i32, i32) {
    %c0_i32 = arith.constant 0 : i32
    %c0_i32_0 = arith.constant 0 : i32
    %c0_i32_1 = arith.constant 0 : i32
    return %c0_i32, %c0_i32_0 : i32, i32
  }
  func.func @transform_2(%arg0: i32) -> (i32, i32) {
    %c0_i32 = arith.constant 0 : i32
    %c0_i32_0 = arith.constant 0 : i32
    %c0_i32_1 = arith.constant 0 : i32
    return %c0_i32, %c0_i32_0 : i32, i32
  }
  func.func @transform_3(%arg0: i32) -> (i32, i32) {
    %c0_i32 = arith.constant 0 : i32
    %c0_i32_0 = arith.constant 0 : i32
    return %arg0, %c0_i32 : i32, i32
  }
}

</mosaic_0001>

<bundles_post_ra>
// kernel: descn_forward.1
= control target key start
LH: loop header
LB: loop body
LE: loop exit
PB: predicated region body
PF: predicated region fallthrough
CT: control target
= control target key end

     0   :  { %8 = vsyncpa [#allocation3], 0  ;;  %s1417_s0 = inlined_call_operand.hbm [shape: f32[8,32], index: 0, kind: input, shape index: {}]   ;;  %s1418_s1 = inlined_call_operand.hbm [shape: f32[896,128], index: 1, kind: input, shape index: {}]   ;;  %s1419_s2 = inlined_call_operand.hbm [shape: f32[8,128], index: 2, kind: input, shape index: {}]   ;;  %s1420_s3 = inlined_call_operand.vmem [shape: f32[8,128], index: 3, kind: output, shape index: {}]  }
   0x1   :  { %9 = vsyncpa [#allocation5], 0  ;;  %s1254_s12 = smov [#allocation4]  }
   0x2   :  { %s25_s13 = sshll.u32 %s1254_s12, 4  ;;  %s26_s13 = int_to_ptr.vmem [resolvable:$true] %s25_s13 }
   0x3   :  { %s1198_s14 = scalar_lea.vmem %s26_s13, 14336  ;;  %p1203_p1 = scmp.lt.s32.totalorder %s26_s13, %s26_s13 }
   0x4   :  { %p1199_p0 = scmp.ne.s32.totalorder %s26_s13, %s1198_s14  ;;  %p1204_p2 = scmp.lt.s32.totalorder %s1198_s14, %s1198_s14 }
   0x6   :  { %p1205_p3 = por %p1204_p2, %p1203_p1 }
   0x8   :  { %p1206_p4 = pnand %p1205_p3, %p1199_p0 }
   0xa   :  { %1209 = shalt.err (!%p1206_p4)
}
   0xb   :  { %s1255_s15 = smov 128   ;;  %s1256_s16 = smov 8  }
   0xc   :  { %31 = dma.hbm_to_vmem [thread:$0]  %s1418_s1, 14336, %s26_s13, [#allocation5], %s1255_s15, %s1255_s15, %s1256_s16  }
   0xd   :  { %s1257_s19 = smov [#allocation2]   ;;  %s1258_s21 = smov [#allocation6]  }
   0xe   :  { %s16_s20 = sshll.u32 %s1257_s19, 4  ;;  %s38_s22 = sshll.u32 %s1258_s21, 4  ;;  %s17_s20 = int_to_ptr.vmem [resolvable:$true] %s16_s20  ;;  %s39_s22 = int_to_ptr.vmem [resolvable:$true] %s38_s22 }
   0xf   :  { %s1218_s23 = scalar_lea.vmem %s17_s20, 128  ;;  %p1223_p6 = scmp.lt.s32.totalorder %s17_s20, %s17_s20 }
  0x10   :  { %p1219_p5 = scmp.ne.s32.totalorder %s17_s20, %s1218_s23  ;;  %p1224_p7 = scmp.lt.s32.totalorder %s1218_s23, %s1218_s23 }
  0x12   :  { %p1225_p8 = por %p1224_p7, %p1223_p6 }
  0x14   :  { %p1226_p9 = pnand %p1225_p8, %p1219_p5 }
  0x16   :  { %1229 = shalt.err (!%p1226_p9)
}
  0x17   :  { %19 = dma.hbm_to_vmem [thread:$0]  %s1417_s0, 128, %s17_s20, [#allocation3]  }
  0x18   :  { %s1238_s26 = scalar_lea.vmem %s39_s22, 128  ;;  %p1243_p11 = scmp.lt.s32.totalorder %s39_s22, %s39_s22 }
  0x19   :  { %p1239_p10 = scmp.ne.s32.totalorder %s39_s22, %s1238_s26  ;;  %p1244_p12 = scmp.lt.s32.totalorder %s1238_s26, %s1238_s26 }
  0x1b   :  { %p1245_p13 = por %p1244_p12, %p1243_p11 }
  0x1d   :  { %p1246_p0 = pnand %p1245_p13, %p1239_p10 }
  0x1f   :  { %1249 = shalt.err (!%p1246_p0)
}
  0x20   :  { %41 = dma.hbm_to_vmem [thread:$0]  %s1419_s2, 128, %s39_s22, [#allocation5]  }
  0x21   :  { %1250 = dma.done.wait [#allocation3], 128  }
  0x22   :  { %1251 = vsyncadd [#allocation3], 4294967168 }
  0x23   :  { %1252 = dma.done.wait [#allocation5], 14464  }
  0x24   :  { %1253 = vsyncadd [#allocation5], 4294952832  ;;  %v1259_v0 = vmov 0.0   ;;  %vm1260_vm0 = vmmov 0   ;;  %v55_v1 = vld [vmem:[#allocation4 + $0x18] sm:$0xff]  ;;  %v54_v2 = vld [vmem:[#allocation4 + $0x10] sm:$0xff] }
  0x25   :  { %931 = vmatprep.subr.mxu0 %v1259_v0  ;;  %939 = vmatprep.mubr.msk.f32.mxu0 %vm1260_vm0, %v1259_v0  ;;  %v156_v3 = vld [vmem:[#allocation4 + $0xf8] sm:$0xff]  ;;  %v53_v4 = vld [vmem:[#allocation4 + $0x8] sm:$0xff]  ;;  %v155_v5 = vld [vmem:[#allocation4 + $0xf0] sm:$0xff]  ;;  %vm61_vm1 = vcmask 261120   ;;  %s1265_s0 = smov 127   ;;  %s1266_s2 = smov 126  }
  0x26   :  { %942 = vmatprep.subr.mxu1 %v1259_v0  ;;  %974 = vmatprep.mubr.msk.f32.mxu1 %vm1260_vm0, %v1259_v0  ;;  %v154_v6 = vld [vmem:[#allocation4 + $0xe8] sm:$0xff]  ;;  %v52_v7 = vld [vmem:[#allocation4] sm:$0xff]  ;;  %v51_v8 = vld [vmem:[#allocation2] sm:$0xff] }
  0x27   :  { %932 = vmatpush3.msra.mxu0 %v55_v1  ;;  %943 = vmatpush3.msra.mxu1 %v156_v3  ;;  %v153_v9 = vld [vmem:[#allocation4 + $0xe0] sm:$0xff]  ;;  %v152_v10 = vld [vmem:[#allocation4 + $0xd8] sm:$0xff]  ;;  %v151_v11 = vld [vmem:[#allocation4 + $0xd0] sm:$0xff] }
  0x28   :  { %933 = vmatprep.subr.mxu0 %v1259_v0  ;;  %944 = vmatprep.subr.mxu1 %v1259_v0  ;;  %v150_v12 = vld [vmem:[#allocation4 + $0xc8] sm:$0xff]  ;;  %v149_v13 = vld [vmem:[#allocation4 + $0xc0] sm:$0xff]  ;;  %v148_v14 = vld [vmem:[#allocation4 + $0xb8] sm:$0xff] }
  0x29   :  { %934 = vmatpush3.msra.mxu0 %v54_v2  ;;  %945 = vmatpush3.msra.mxu1 %v155_v5  ;;  %v147_v15 = vld [vmem:[#allocation4 + $0xb0] sm:$0xff]  ;;  %v146_v16 = vld [vmem:[#allocation4 + $0xa8] sm:$0xff]  ;;  %v145_v17 = vld [vmem:[#allocation4 + $0xa0] sm:$0xff] }
  0x2a   :  { %935 = vmatprep.subr.mxu0 %v1259_v0  ;;  %946 = vmatprep.subr.mxu1 %v1259_v0  ;;  %v144_v18 = vld [vmem:[#allocation4 + $0x98] sm:$0xff]  ;;  %v143_v19 = vld [vmem:[#allocation4 + $0x90] sm:$0xff]  ;;  %v142_v20 = vld [vmem:[#allocation4 + $0x88] sm:$0xff] }
  0x2b   :  { %936 = vmatpush3.msra.mxu0 %v53_v4  ;;  %947 = vmatpush3.msra.mxu1 %v154_v6  ;;  %v141_v21 = vld [vmem:[#allocation4 + $0x80] sm:$0xff]  ;;  %v253_v22 = vld [vmem:[#allocation4 + $0x178] sm:$0xff]  ;;  %v252_v23 = vld [vmem:[#allocation4 + $0x170] sm:$0xff] }
  0x2c   :  { %937 = vmatprep.subr.mxu0 %v1259_v0  ;;  %948 = vmatprep.subr.mxu1 %v1259_v0  ;;  %v251_v24 = vld [vmem:[#allocation4 + $0x168] sm:$0xff]  ;;  %v250_v25 = vld [vmem:[#allocation4 + $0x160] sm:$0xff]  ;;  %v249_v35 = vld [vmem:[#allocation4 + $0x158] sm:$0xff] }
  0x2d   :  { %938 = vmatpush3.msra.mxu0 %v52_v7  ;;  %949 = vmatpush3.msra.mxu1 %v153_v9  ;;  %v810_v26 = vld [vmem:[#allocation6] ss:$0 sm:$0xff]  ;;  %v248_v36 = vld [vmem:[#allocation4 + $0x150] sm:$0xff]  ;;  %v247_v37 = vld [vmem:[#allocation4 + $0x148] sm:$0xff] }
  0x2e   :  { %940 = vmatmul.mubr.msk.f32.vlgmr.msra.gmra.mxu0 %vm61_vm1, %v51_v8  ;;  %950 = vmatprep.subr.mxu1 %v1259_v0  ;;  %v246_v38 = vld [vmem:[#allocation4 + $0x140] sm:$0xff]  ;;  %v245_v39 = vld [vmem:[#allocation4 + $0x138] sm:$0xff]  ;;  %v244_v40 = vld [vmem:[#allocation4 + $0x130] sm:$0xff] }
  0x2f   :  { %977 = vmatprep.subr.mxu0 %v1259_v0  ;;  %1009 = vmatprep.mubr.msk.f32.mxu0 %vm1260_vm0, %v1259_v0  ;;  %v243_v41 = vld [vmem:[#allocation4 + $0x128] sm:$0xff]  ;;  %v242_v42 = vld [vmem:[#allocation4 + $0x120] sm:$0xff]  ;;  %v241_v43 = vld [vmem:[#allocation4 + $0x118] sm:$0xff] }
  0x30   :  { %951 = vmatpush3.msra.mxu1 %v152_v10  ;;  %978 = vmatpush3.msra.mxu0 %v253_v22  ;;  %v240_v44 = vld [vmem:[#allocation4 + $0x110] sm:$0xff]  ;;  %v239_v45 = vld [vmem:[#allocation4 + $0x108] sm:$0xff]  ;;  %v238_v46 = vld [vmem:[#allocation4 + $0x100] sm:$0xff] }
  0x31   :  { %952 = vmatprep.subr.mxu1 %v1259_v0  ;;  %979 = vmatprep.subr.mxu0 %v1259_v0  ;;  %v350_v47 = vld [vmem:[#allocation4 + $0x1f8] sm:$0xff]  ;;  %v349_v48 = vld [vmem:[#allocation4 + $0x1f0] sm:$0xff]  ;;  %v348_v49 = vld [vmem:[#allocation4 + $0x1e8] sm:$0xff] }
  0x32   :  { %953 = vmatpush3.msra.mxu1 %v151_v11  ;;  %980 = vmatpush3.msra.mxu0 %v252_v23  ;;  %v347_v50 = vld [vmem:[#allocation4 + $0x1e0] sm:$0xff]  ;;  %v346_v60 = vld [vmem:[#allocation4 + $0x1d8] sm:$0xff]  ;;  %v345_v61 = vld [vmem:[#allocation4 + $0x1d0] sm:$0xff] }
  0x33   :  { %954 = vmatprep.subr.mxu1 %v1259_v0  ;;  %981 = vmatprep.subr.mxu0 %v1259_v0  ;;  %v813_v51 = vld [vmem:[#allocation6 + $0x1] ss:$0 sm:$0xff]  ;;  %v344_v62 = vld [vmem:[#allocation4 + $0x1c8] sm:$0xff]  ;;  %v342_v1 = vld [vmem:[#allocation4 + $0x1b8] sm:$0xff] }
  0x34   :  { %955 = vmatpush3.msra.mxu1 %v150_v12  ;;  %982 = vmatpush3.msra.mxu0 %v251_v24  ;;  %v343_v63 = vld [vmem:[#allocation4 + $0x1c0] sm:$0xff]  ;;  %v341_v2 = vld [vmem:[#allocation4 + $0x1b0] sm:$0xff]  ;;  %v340_v3 = vld [vmem:[#allocation4 + $0x1a8] sm:$0xff] }
  0x35   :  { %956 = vmatprep.subr.mxu1 %v1259_v0  ;;  %983 = vmatprep.subr.mxu0 %v1259_v0  ;;  %v339_v4 = vld [vmem:[#allocation4 + $0x1a0] sm:$0xff]  ;;  %v338_v5 = vld [vmem:[#allocation4 + $0x198] sm:$0xff]  ;;  %v337_v6 = vld [vmem:[#allocation4 + $0x190] sm:$0xff] }
  0x36   :  { %957 = vmatpush3.msra.mxu1 %v149_v13  ;;  %984 = vmatpush3.msra.mxu0 %v250_v25  ;;  %v336_v7 = vld [vmem:[#allocation4 + $0x188] sm:$0xff]  ;;  %v335_v8 = vld [vmem:[#allocation4 + $0x180] sm:$0xff]  ;;  %v447_v9 = vld [vmem:[#allocation4 + $0x278] sm:$0xff] }
  0x37   :  { %958 = vmatprep.subr.mxu1 %v1259_v0  ;;  %985 = vmatprep.subr.mxu0 %v1259_v0  ;;  %v446_v10 = vld [vmem:[#allocation4 + $0x270] sm:$0xff]  ;;  %v445_v11 = vld [vmem:[#allocation4 + $0x268] sm:$0xff]  ;;  %v444_v12 = vld [vmem:[#allocation4 + $0x260] sm:$0xff] }
  0x38   :  { %959 = vmatpush3.msra.mxu1 %v148_v14  ;;  %986 = vmatpush3.msra.mxu0 %v249_v35  ;;  %v815_v13 = vld [vmem:[#allocation6 + $0x2] ss:$0 sm:$0xff]  ;;  %v443_v22 = vld [vmem:[#allocation4 + $0x258] sm:$0xff]  ;;  %v442_v23 = vld [vmem:[#allocation4 + $0x250] sm:$0xff] }
  0x39   :  { %960 = vmatprep.subr.mxu1 %v1259_v0  ;;  %987 = vmatprep.subr.mxu0 %v1259_v0  ;;  %v441_v24 = vld [vmem:[#allocation4 + $0x248] sm:$0xff]  ;;  %v440_v25 = vld [vmem:[#allocation4 + $0x240] sm:$0xff]  ;;  %v543_v35 = vld [vmem:[#allocation4 + $0x2f0] sm:$0xff] }
  0x3a   :  { %961 = vmatpush3.msra.mxu1 %v147_v15  ;;  %988 = vmatpush3.msra.mxu0 %v248_v36  ;;  %v542_v36 = vld [vmem:[#allocation4 + $0x2e8] sm:$0xff] }
  0x3b   :  { %962 = vmatprep.subr.mxu1 %v1259_v0  ;;  %989 = vmatprep.subr.mxu0 %v1259_v0 }
  0x3c   :  { %963 = vmatpush3.msra.mxu1 %v146_v16  ;;  %990 = vmatpush3.msra.mxu0 %v247_v37  ;;  %v541_v37 = vld [vmem:[#allocation4 + $0x2e0] sm:$0xff] }
  0x3d   :  { %964 = vmatprep.subr.mxu1 %v1259_v0  ;;  %991 = vmatprep.subr.mxu0 %v1259_v0 }
  0x3e   :  { %965 = vmatpush3.msra.mxu1 %v145_v17  ;;  %992 = vmatpush3.msra.mxu0 %v246_v38  ;;  %v817_v38 = vld [vmem:[#allocation6 + $0x3] ss:$0 sm:$0xff] }
  0x3f   :  { %966 = vmatprep.subr.mxu1 %v1259_v0  ;;  %993 = vmatprep.subr.mxu0 %v1259_v0 }
  0x40   :  { %967 = vmatpush3.msra.mxu1 %v144_v18  ;;  %994 = vmatpush3.msra.mxu0 %v245_v39 }
  0x41   :  { %968 = vmatprep.subr.mxu1 %v1259_v0  ;;  %995 = vmatprep.subr.mxu0 %v1259_v0 }
  0x42   :  { %969 = vmatpush3.msra.mxu1 %v143_v19  ;;  %996 = vmatpush3.msra.mxu0 %v244_v40 }
  0x43   :  { %970 = vmatprep.subr.mxu1 %v1259_v0  ;;  %997 = vmatprep.subr.mxu0 %v1259_v0 }
  0x44   :  { %971 = vmatpush3.msra.mxu1 %v142_v20  ;;  %998 = vmatpush3.msra.mxu0 %v243_v41 }
  0x45   :  { %972 = vmatprep.subr.mxu1 %v1259_v0  ;;  %999 = vmatprep.subr.mxu0 %v1259_v0 }
  0x46   :  { %973 = vmatpush3.msra.mxu1 %v141_v21  ;;  %1000 = vmatpush3.msra.mxu0 %v242_v42 }
  0x47   :  { %1012 = vmatprep.subr.mxu1 %v1259_v0  ;;  %1001 = vmatprep.subr.mxu0 %v1259_v0 }
  0x48   :  { %1002 = vmatpush3.msra.mxu0 %v241_v43 }
  0x49   :  { %1003 = vmatprep.subr.mxu0 %v1259_v0 }
  0x4a   :  { %1004 = vmatpush3.msra.mxu0 %v240_v44 }
  0x4b   :  { %1005 = vmatprep.subr.mxu0 %v1259_v0 }
  0x4c   :  { %1006 = vmatpush3.msra.mxu0 %v239_v45 }
  0x4d   :  { %1007 = vmatprep.subr.mxu0 %v1259_v0 }
  0x4e   :  { %1008 = vmatpush3.msra.mxu0 %v238_v46 }
  0x4f   :  { %1047 = vmatprep.subr.mxu0 %v1259_v0 }
  0xee   :  { %v131_v27 = vpop.f32.mrf.mxu0 }
  0xef   :  { %v132_v28 = vadd.f32 %v810_v26, %v131_v27  ;;  %v439_v26 = vld [vmem:[#allocation4 + $0x238] sm:$0xff]  ;;  %v438_v27 = vld [vmem:[#allocation4 + $0x230] sm:$0xff] }
  0xf0   :  { %v941_v29 = vpop.f32.mrf.mxu0 }
  0xf1   :  { %v136_v30 = vmin.f32 %v132_v28, 0.0  ;;  %vm135_vm2 = vcmp.gt.f32.partialorder %v132_v28, 0.0  ;;  %v436_v29 = vld [vmem:[#allocation4 + $0x220] sm:$0xff] }
  0xf3   :  { %v137_v31 = vmul.f32 1.442695, %v136_v30  ;;  %v435_v30 = vld [vmem:[#allocation4 + $0x218] sm:$0xff] }
  0xf5   :  { %1174 = vpow2.f32 %v137_v31  ;;  %v434_v31 = vld [vmem:[#allocation4 + $0x210] sm:$0xff] }
 0x102   :  { %v1175_v32 = vpop.eup %1174 }
 0x103   :  { %v812_v33 = vadd.f32 -1.0, %v1175_v32  ;;  %v433_v32 = vld [vmem:[#allocation4 + $0x208] sm:$0xff] }
 0x105   :  { %v140_v34 = vsel %vm135_vm2, %v132_v28, %v812_v33  ;;  %v437_v28 = vld [vmem:[#allocation4 + $0x228] sm:$0xff]  ;;  %v432_v33 = vld [vmem:[#allocation4 + $0x200] sm:$0xff] }
 0x106   :  { %975 = vmatmul.mubr.f32.vlgmr.msra.gmra.mxu1 %v140_v34  ;;  %v544_v34 = vld [vmem:[#allocation4 + $0x2f8] sm:$0xff] }
 0x107   :  { %1044 = vmatprep.mubr.msk.f32.mxu1 %vm1260_vm0, %v1259_v0  ;;  %1013 = vmatpush3.msra.mxu1 %v350_v47  ;;  %v540_v47 = vld [vmem:[#allocation4 + $0x2d8] sm:$0xff] }
 0x108   :  { %1014 = vmatprep.subr.mxu1 %v1259_v0 }
 0x109   :  { %1015 = vmatpush3.msra.mxu1 %v349_v48  ;;  %v539_v48 = vld [vmem:[#allocation4 + $0x2d0] sm:$0xff] }
 0x10a   :  { %1016 = vmatprep.subr.mxu1 %v1259_v0 }
 0x10b   :  { %1017 = vmatpush3.msra.mxu1 %v348_v49  ;;  %v538_v49 = vld [vmem:[#allocation4 + $0x2c8] sm:$0xff] }
 0x10c   :  { %1018 = vmatprep.subr.mxu1 %v1259_v0 }
 0x10d   :  { %1019 = vmatpush3.msra.mxu1 %v347_v50  ;;  %v537_v50 = vld [vmem:[#allocation4 + $0x2c0] sm:$0xff] }
 0x10e   :  { %1020 = vmatprep.subr.mxu1 %v1259_v0 }
 0x10f   :  { %1021 = vmatpush3.msra.mxu1 %v346_v60  ;;  %v640_v60 = vld [vmem:[#allocation4 + $0x370] sm:$0xff] }
 0x110   :  { %1022 = vmatprep.subr.mxu1 %v1259_v0 }
 0x111   :  { %1023 = vmatpush3.msra.mxu1 %v345_v61  ;;  %v639_v61 = vld [vmem:[#allocation4 + $0x368] sm:$0xff] }
 0x112   :  { %1024 = vmatprep.subr.mxu1 %v1259_v0 }
 0x113   :  { %1025 = vmatpush3.msra.mxu1 %v344_v62  ;;  %v638_v62 = vld [vmem:[#allocation4 + $0x360] sm:$0xff] }
 0x114   :  { %1026 = vmatprep.subr.mxu1 %v1259_v0 }
 0x115   :  { %1027 = vmatpush3.msra.mxu1 %v343_v63  ;;  %v819_v63 = vld [vmem:[#allocation6 + $0x4] ss:$0 sm:$0xff] }
 0x116   :  { %1028 = vmatprep.subr.mxu1 %v1259_v0 }
 0x117   :  { %1029 = vmatpush3.msra.mxu1 %v342_v1 }
 0x118   :  { %1030 = vmatprep.subr.mxu1 %v1259_v0 }
 0x119   :  { %1031 = vmatpush3.msra.mxu1 %v341_v2 }
 0x11a   :  { %1032 = vmatprep.subr.mxu1 %v1259_v0 }
 0x11b   :  { %1033 = vmatpush3.msra.mxu1 %v340_v3 }
 0x11c   :  { %1034 = vmatprep.subr.mxu1 %v1259_v0 }
 0x11d   :  { %1035 = vmatpush3.msra.mxu1 %v339_v4 }
 0x11e   :  { %1036 = vmatprep.subr.mxu1 %v1259_v0 }
 0x11f   :  { %1037 = vmatpush3.msra.mxu1 %v338_v5 }
 0x120   :  { %1038 = vmatprep.subr.mxu1 %v1259_v0 }
 0x121   :  { %1039 = vmatpush3.msra.mxu1 %v337_v6 }
 0x122   :  { %1040 = vmatprep.subr.mxu1 %v1259_v0 }
 0x123   :  { %1041 = vmatpush3.msra.mxu1 %v336_v7 }
 0x124   :  { %1042 = vmatprep.subr.mxu1 %v1259_v0 }
 0x125   :  { %1043 = vmatpush3.msra.mxu1 %v335_v8 }
 0x126   :  { %1082 = vmatprep.subr.mxu1 %v1259_v0 }
 0x1c6   :  { %v228_v52 = vpop.f32.mrf.mxu1 }
 0x1c7   :  { %v229_v53 = vadd.f32 %v813_v51, %v228_v52  ;;  %v536_v51 = vld [vmem:[#allocation4 + $0x2b8] sm:$0xff]  ;;  %v535_v52 = vld [vmem:[#allocation4 + $0x2b0] sm:$0xff] }
 0x1c8   :  { %v976_v54 = vpop.f32.mrf.mxu1 }
 0x1c9   :  { %v233_v55 = vmin.f32 %v229_v53, 0.0  ;;  %vm232_vm3 = vcmp.gt.f32.partialorder %v229_v53, 0.0  ;;  %v533_v54 = vld [vmem:[#allocation4 + $0x2a0] sm:$0xff] }
 0x1cb   :  { %v234_v56 = vmul.f32 1.442695, %v233_v55  ;;  %v532_v55 = vld [vmem:[#allocation4 + $0x298] sm:$0xff] }
 0x1cd   :  { %1176 = vpow2.f32 %v234_v56  ;;  %v531_v56 = vld [vmem:[#allocation4 + $0x290] sm:$0xff] }
 0x1da   :  { %v1177_v57 = vpop.eup %1176 }
 0x1db   :  { %v814_v58 = vadd.f32 -1.0, %v1177_v57  ;;  %v530_v57 = vld [vmem:[#allocation4 + $0x288] sm:$0xff] }
 0x1dd   :  { %v237_v59 = vsel %vm232_vm3, %v229_v53, %v814_v58  ;;  %v534_v53 = vld [vmem:[#allocation4 + $0x2a8] sm:$0xff]  ;;  %v529_v58 = vld [vmem:[#allocation4 + $0x280] sm:$0xff] }
 0x1de   :  { %1010 = vmatmul.mubr.f32.vlgmr.msra.gmra.mxu0 %v237_v59  ;;  %v641_v59 = vld [vmem:[#allocation4 + $0x378] sm:$0xff] }
 0x1df   :  { %1079 = vmatprep.mubr.msk.f32.mxu0 %vm1260_vm0, %v1259_v0  ;;  %1048 = vmatpush3.msra.mxu0 %v447_v9  ;;  %v637_v9 = vld [vmem:[#allocation4 + $0x358] sm:$0xff] }
 0x1e0   :  { %1049 = vmatprep.subr.mxu0 %v1259_v0 }
 0x1e1   :  { %1050 = vmatpush3.msra.mxu0 %v446_v10  ;;  %v636_v10 = vld [vmem:[#allocation4 + $0x350] sm:$0xff] }
 0x1e2   :  { %1051 = vmatprep.subr.mxu0 %v1259_v0 }
 0x1e3   :  { %1052 = vmatpush3.msra.mxu0 %v445_v11  ;;  %v635_v11 = vld [vmem:[#allocation4 + $0x348] sm:$0xff] }
 0x1e4   :  { %1053 = vmatprep.subr.mxu0 %v1259_v0 }
 0x1e5   :  { %1054 = vmatpush3.msra.mxu0 %v444_v12  ;;  %v634_v12 = vld [vmem:[#allocation4 + $0x340] sm:$0xff] }
 0x1e6   :  { %1055 = vmatprep.subr.mxu0 %v1259_v0 }
 0x1e7   :  { %1056 = vmatpush3.msra.mxu0 %v443_v22  ;;  %v821_v22 = vld [vmem:[#allocation6 + $0x5] ss:$0 sm:$0xff] }
 0x1e8   :  { %1057 = vmatprep.subr.mxu0 %v1259_v0 }
 0x1e9   :  { %1058 = vmatpush3.msra.mxu0 %v442_v23 }
 0x1ea   :  { %1059 = vmatprep.subr.mxu0 %v1259_v0 }
 0x1eb   :  { %1060 = vmatpush3.msra.mxu0 %v441_v24 }
 0x1ec   :  { %1061 = vmatprep.subr.mxu0 %v1259_v0 }
 0x1ed   :  { %1062 = vmatpush3.msra.mxu0 %v440_v25 }
 0x1ee   :  { %1063 = vmatprep.subr.mxu0 %v1259_v0 }
 0x1ef   :  { %1064 = vmatpush3.msra.mxu0 %v439_v26 }
 0x1f0   :  { %1065 = vmatprep.subr.mxu0 %v1259_v0 }
 0x1f1   :  { %1066 = vmatpush3.msra.mxu0 %v438_v27 }
 0x1f2   :  { %1067 = vmatprep.subr.mxu0 %v1259_v0 }
 0x1f3   :  { %1068 = vmatpush3.msra.mxu0 %v437_v28 }
 0x1f4   :  { %1069 = vmatprep.subr.mxu0 %v1259_v0 }
 0x1f5   :  { %1070 = vmatpush3.msra.mxu0 %v436_v29 }
 0x1f6   :  { %1071 = vmatprep.subr.mxu0 %v1259_v0 }
 0x1f7   :  { %1072 = vmatpush3.msra.mxu0 %v435_v30 }
 0x1f8   :  { %1073 = vmatprep.subr.mxu0 %v1259_v0 }
 0x1f9   :  { %1074 = vmatpush3.msra.mxu0 %v434_v31  ;;  %v1261_v31 = vmov 0  }
 0x1fa   :  { %1075 = vmatprep.subr.mxu0 %v1259_v0  ;;  %1165 = vset.pattern.permute.xlu1 %v1261_v31 }
 0x1fb   :  { %1076 = vmatpush3.msra.mxu0 %v433_v32  ;;  %v1262_v32 = vmov 2  }
 0x1fc   :  { %1077 = vmatprep.subr.mxu0 %v1259_v0  ;;  %1168 = vset.pattern.permute.xlu0 %v1262_v32 }
 0x1fd   :  { %1078 = vmatpush3.msra.mxu0 %v432_v33  ;;  %v823_v33 = vld [vmem:[#allocation6 + $0x6] ss:$0 sm:$0xff] }
 0x1fe   :  { %1117 = vmatprep.subr.mxu0 %v1259_v0 }
 0x29e   :  { %v325_v14 = vpop.f32.mrf.mxu0 }
 0x29f   :  { %v326_v15 = vadd.f32 %v815_v13, %v325_v14  ;;  %v633_v13 = vld [vmem:[#allocation4 + $0x338] sm:$0xff]  ;;  %v632_v14 = vld [vmem:[#allocation4 + $0x330] sm:$0xff] }
 0x2a0   :  { %v1011_v16 = vpop.f32.mrf.mxu0 }
 0x2a1   :  { %v330_v17 = vmin.f32 %v326_v15, 0.0  ;;  %vm329_vm4 = vcmp.gt.f32.partialorder %v326_v15, 0.0  ;;  %v630_v16 = vld [vmem:[#allocation4 + $0x320] sm:$0xff] }
 0x2a3   :  { %v331_v18 = vmul.f32 1.442695, %v330_v17  ;;  %v629_v17 = vld [vmem:[#allocation4 + $0x318] sm:$0xff] }
 0x2a5   :  { %1178 = vpow2.f32 %v331_v18  ;;  %v628_v18 = vld [vmem:[#allocation4 + $0x310] sm:$0xff] }
 0x2b2   :  { %v1179_v19 = vpop.eup %1178 }
 0x2b3   :  { %v816_v20 = vadd.f32 -1.0, %v1179_v19  ;;  %v627_v19 = vld [vmem:[#allocation4 + $0x308] sm:$0xff] }
 0x2b5   :  { %v1364_v21 = vsel %vm329_vm4, %v326_v15, %v816_v20  ;;  %v631_v15 = vld [vmem:[#allocation4 + $0x328] sm:$0xff]  ;;  %v626_v20 = vld [vmem:[#allocation4 + $0x300] sm:$0xff] }
 0x2b6   :  { %1045 = vmatmul.mubr.f32.vlgmr.msra.gmra.mxu1 %v1364_v21 }
 0x2b7   :  { %1114 = vmatprep.mubr.msk.f32.mxu1 %vm1260_vm0, %v1259_v0  ;;  %1083 = vmatpush3.msra.mxu1 %v544_v34 }
 0x2b8   :  { %1084 = vmatprep.subr.mxu1 %v1259_v0 }
 0x2b9   :  { %1085 = vmatpush3.msra.mxu1 %v543_v35 }
 0x2ba   :  { %1086 = vmatprep.subr.mxu1 %v1259_v0 }
 0x2bb   :  { %1087 = vmatpush3.msra.mxu1 %v542_v36 }
 0x2bc   :  { %1088 = vmatprep.subr.mxu1 %v1259_v0 }
 0x2bd   :  { %1089 = vmatpush3.msra.mxu1 %v541_v37 }
 0x2be   :  { %1090 = vmatprep.subr.mxu1 %v1259_v0 }
 0x2bf   :  { %1091 = vmatpush3.msra.mxu1 %v540_v47 }
 0x2c0   :  { %1092 = vmatprep.subr.mxu1 %v1259_v0 }
 0x2c1   :  { %1093 = vmatpush3.msra.mxu1 %v539_v48 }
 0x2c2   :  { %1094 = vmatprep.subr.mxu1 %v1259_v0 }
 0x2c3   :  { %1095 = vmatpush3.msra.mxu1 %v538_v49 }
 0x2c4   :  { %1096 = vmatprep.subr.mxu1 %v1259_v0 }
 0x2c5   :  { %1097 = vmatpush3.msra.mxu1 %v537_v50 }
 0x2c6   :  { %1098 = vmatprep.subr.mxu1 %v1259_v0 }
 0x2c7   :  { %1099 = vmatpush3.msra.mxu1 %v536_v51 }
 0x2c8   :  { %1100 = vmatprep.subr.mxu1 %v1259_v0 }
 0x2c9   :  { %1101 = vmatpush3.msra.mxu1 %v535_v52 }
 0x2ca   :  { %1102 = vmatprep.subr.mxu1 %v1259_v0 }
 0x2cb   :  { %1103 = vmatpush3.msra.mxu1 %v534_v53  ;;  %v736_v53 = vlaneseq }
 0x2cc   :  { %1104 = vmatprep.subr.mxu1 %v1259_v0 }
 0x2cd   :  { %1105 = vmatpush3.msra.mxu1 %v533_v54 }
 0x2ce   :  { %1106 = vmatprep.subr.mxu1 %v1259_v0 }
 0x2cf   :  { %1107 = vmatpush3.msra.mxu1 %v532_v55  ;;  %v737_v55 = vand.u32 127, %v736_v53 }
 0x2d0   :  { %1108 = vmatprep.subr.mxu1 %v1259_v0 }
 0x2d1   :  { %1109 = vmatpush3.msra.mxu1 %v531_v56  ;;  %vm738_vm8 = vcmp.eq.s32.totalorder %v737_v55, 0  ;;  %vm745_vm9 = vcmp.eq.s32.totalorder %v737_v55, 1  ;;  %vm752_vm10 = vcmp.eq.s32.totalorder %v737_v55, 2  ;;  %vm759_vm11 = vcmp.eq.s32.totalorder %v737_v55, 3 }
 0x2d2   :  { %1110 = vmatprep.subr.mxu1 %v1259_v0  ;;  %vm765_vm12 = vcmp.eq.s32.totalorder %v737_v55, 4  ;;  %vm771_vm13 = vcmp.eq.s32.totalorder %v737_v55, 5  ;;  %vm777_vm14 = vcmp.eq.s32.totalorder %v737_v55, 6  ;;  %vm784_vm15 = vcmp.eq.s32.totalorder %v737_v55, 7 }
 0x2d3   :  { %1111 = vmatpush3.msra.mxu1 %v530_v57  ;;  %vm796_vm1 = vcmp.eq.s32.totalorder %v737_v55, 9 }
 0x2d4   :  { %1112 = vmatprep.subr.mxu1 %v1259_v0 }
 0x2d5   :  { %1113 = vmatpush3.msra.mxu1 %v529_v58 }
 0x376   :  { %v422_v39 = vpop.f32.mrf.mxu1 }
 0x377   :  { %v423_v40 = vadd.f32 %v817_v38, %v422_v39  ;;  %v1263_v38 = vmov 3   ;;  %v1264_v39 = vmov 1  }
 0x378   :  { %v1046_v41 = vpop.f32.mrf.mxu1 }
 0x379   :  { %v427_v42 = vmin.f32 %v423_v40, 0.0  ;;  %vm426_vm5 = vcmp.gt.f32.partialorder %v423_v40, 0.0 }
 0x37b   :  { %v428_v43 = vmul.f32 1.442695, %v427_v42 }
 0x37d   :  { %1180 = vpow2.f32 %v428_v43 }
 0x38a   :  { %v1181_v44 = vpop.eup %1180 }
 0x38b   :  { %v818_v45 = vadd.f32 -1.0, %v1181_v44 }
 0x38d   :  { %v431_v46 = vsel %vm426_vm5, %v423_v40, %v818_v45 }
 0x38e   :  { %1080 = vmatmul.mubr.f32.vlgmr.msra.gmra.mxu0 %v431_v46 }
 0x38f   :  { %1149 = vmatprep.mubr.msk.f32.mxu0 %vm1260_vm0, %v1259_v0  ;;  %1118 = vmatpush3.msra.mxu0 %v641_v59  ;;  %vm790_vm0 = vcmp.eq.s32.totalorder %v737_v55, 8 }
 0x390   :  { %1119 = vmatprep.subr.mxu0 %v1259_v0 }
 0x391   :  { %1120 = vmatpush3.msra.mxu0 %v640_v60 }
 0x392   :  { %1121 = vmatprep.subr.mxu0 %v1259_v0 }
 0x393   :  { %1122 = vmatpush3.msra.mxu0 %v639_v61 }
 0x394   :  { %1123 = vmatprep.subr.mxu0 %v1259_v0 }
 0x395   :  { %1124 = vmatpush3.msra.mxu0 %v638_v62 }
 0x396   :  { %1125 = vmatprep.subr.mxu0 %v1259_v0 }
 0x397   :  { %1126 = vmatpush3.msra.mxu0 %v637_v9 }
 0x398   :  { %1127 = vmatprep.subr.mxu0 %v1259_v0 }
 0x399   :  { %1128 = vmatpush3.msra.mxu0 %v636_v10 }
 0x39a   :  { %1129 = vmatprep.subr.mxu0 %v1259_v0 }
 0x39b   :  { %1130 = vmatpush3.msra.mxu0 %v635_v11 }
 0x39c   :  { %1131 = vmatprep.subr.mxu0 %v1259_v0 }
 0x39d   :  { %1132 = vmatpush3.msra.mxu0 %v634_v12 }
 0x39e   :  { %1133 = vmatprep.subr.mxu0 %v1259_v0 }
 0x39f   :  { %1134 = vmatpush3.msra.mxu0 %v633_v13 }
 0x3a0   :  { %1135 = vmatprep.subr.mxu0 %v1259_v0 }
 0x3a1   :  { %1136 = vmatpush3.msra.mxu0 %v632_v14 }
 0x3a2   :  { %1137 = vmatprep.subr.mxu0 %v1259_v0 }
 0x3a3   :  { %1138 = vmatpush3.msra.mxu0 %v631_v15 }
 0x3a4   :  { %1139 = vmatprep.subr.mxu0 %v1259_v0 }
 0x3a5   :  { %1140 = vmatpush3.msra.mxu0 %v630_v16 }
 0x3a6   :  { %1141 = vmatprep.subr.mxu0 %v1259_v0 }
 0x3a7   :  { %1142 = vmatpush3.msra.mxu0 %v629_v17 }
 0x3a8   :  { %1143 = vmatprep.subr.mxu0 %v1259_v0 }
 0x3a9   :  { %1144 = vmatpush3.msra.mxu0 %v628_v18 }
 0x3aa   :  { %1145 = vmatprep.subr.mxu0 %v1259_v0 }
 0x3ab   :  { %1146 = vmatpush3.msra.mxu0 %v627_v19 }
 0x3ac   :  { %1147 = vmatprep.subr.mxu0 %v1259_v0 }
 0x3ad   :  { %1148 = vmatpush3.msra.mxu0 %v626_v20 }
 0x44e   :  { %v519_v1 = vpop.f32.mrf.mxu0 }
 0x44f   :  { %v520_v2 = vadd.f32 %v819_v63, %v519_v1 }
 0x450   :  { %v1081_v3 = vpop.f32.mrf.mxu0 }
 0x451   :  { %v524_v4 = vmin.f32 %v520_v2, 0.0  ;;  %vm523_vm6 = vcmp.gt.f32.partialorder %v520_v2, 0.0 }
 0x453   :  { %v525_v5 = vmul.f32 1.442695, %v524_v4 }
 0x455   :  { %1182 = vpow2.f32 %v525_v5 }
 0x462   :  { %v1183_v6 = vpop.eup %1182 }
 0x463   :  { %v820_v7 = vadd.f32 -1.0, %v1183_v6 }
 0x465   :  { %v528_v8 = vsel %vm523_vm6, %v520_v2, %v820_v7 }
 0x466   :  { %1115 = vmatmul.mubr.f32.vlgmr.msra.gmra.mxu1 %v528_v8 }
 0x526   :  { %v616_v23 = vpop.f32.mrf.mxu1 }
 0x527   :  { %v617_v24 = vadd.f32 %v821_v22, %v616_v23 }
 0x528   :  { %v1116_v25 = vpop.f32.mrf.mxu1 }
 0x529   :  { %v621_v26 = vmin.f32 %v617_v24, 0.0  ;;  %vm620_vm7 = vcmp.gt.f32.partialorder %v617_v24, 0.0 }
 0x52b   :  { %v622_v27 = vmul.f32 1.442695, %v621_v26 }
 0x52d   :  { %1184 = vpow2.f32 %v622_v27 }
 0x53a   :  { %v1185_v28 = vpop.eup %1184 }
 0x53b   :  { %v822_v29 = vadd.f32 -1.0, %v1185_v28 }
 0x53d   :  { %v625_v30 = vsel %vm620_vm7, %v617_v24, %v822_v29 }
 0x53e   :  { %1150 = vmatmul.mubr.f32.vlgmr.msra.gmra.mxu0 %v625_v30 }
 0x5fe   :  { %v713_v34 = vpop.f32.mrf.mxu0 }
 0x5ff   :  { %v714_v0 = vadd.f32 %v823_v33, %v713_v34 }
 0x600   :  { %v1151_v35 = vpop.f32.mrf.mxu0 }
 0x601   :  { %v717_v36 = vsub.f32 0.0, %v714_v0  ;;  %741 = vperm.xlu1 %1165, %v714_v0  }
 0x603   :  { %v718_v37 = vmul.f32 1.442695, %v717_v36 }
 0x605   :  { %1186 = vpow2.f32 %v718_v37  ;;  %1166 = vset.pattern.permute.xlu1 %v1263_v38 }
 0x606   :  { %761 = vperm.xlu1 %1166, %v714_v0  }
 0x60a   :  { %1167 = vset.pattern.permute.xlu1 %v1264_v39 }
 0x60b   :  { %767 = vperm.xlu1 %1167, %v714_v0  }
 0x60f   :  { %1169 = vset.pattern.permute.xlu1 %v1261_v31 }
 0x612   :  { %v1187_v40 = vpop.eup %1186 }
 0x613   :  { %v720_v41 = vadd.f32 1.0, %v1187_v40 }
 0x615   :  { %1188 = vrcp.f32 %v720_v41 }
 0x622   :  { %v1189_v42 = vpop.eup %1188 }
 0x623   :  { %726 = vrot.lane.b32.xlu0 %v1189_v42, %s1265_s0  ;;  %v723_v43 = vmax.f32 %v1189_v42, 0.001 }
 0x625   :  { %v724_v44 = vmin.f32 %v723_v43, 0.999 }
 0x627   :  { %731 = vrot.lane.b32.xlu0 %v1189_v42, %s1266_s2  ;;  %780 = vperm.xlu1 %1169, %v724_v44   ;;  %v730_v47 = vsub.f32 1.0, %v724_v44 }
 0x62b   :  { %773 = vperm.xlu0 %1168, %v714_v0  }
 0x62f   :  { %1171 = vset.pattern.permute.xlu0 %v1261_v31 }
 0x67c   :  { %v742_v51 = vpop.permute.xlu1 %741 }
 0x67d   :  { %v744_v59 = vsel %vm738_vm8, %v742_v51, %v1364_v21 }
 0x681   :  { %v762_v52 = vpop.permute.xlu1 %761 }
 0x686   :  { %v768_v54 = vpop.permute.xlu1 %767 }
 0x695   :  { %v727_v45 = vpop.permute.xlu0 %726 }
 0x696   :  { %v729_v46 = vmul.f32 %v727_v45, %v724_v44  ;;  %v735_v50 = vsub.f32 %v1189_v42, %v727_v45 }
 0x698   :  { %748 = vperm.xlu1 %1169, %v729_v46  }
 0x699   :  { %v732_v48 = vpop.permute.xlu0 %731 }
 0x69a   :  { %v734_v49 = vmul.f32 %v732_v48, %v730_v47 }
 0x69c   :  { %755 = vperm.xlu0 %1171, %v734_v49   ;;  %1170 = vset.pattern.permute.xlu1 %v1264_v39 }
 0x69d   :  { %786 = vperm.xlu1 %1170, %v1189_v42  }
 0x6a0   :  { %1172 = vset.pattern.permute.xlu0 %v1262_v32 }
 0x6a1   :  { %792 = vperm.xlu0 %1172, %v1189_v42   ;;  %799 = vperm.xlu1 %1170, %v735_v50  }
 0x6a2   :  { %v781_v56 = vpop.permute.xlu1 %780 }
 0x6a5   :  { %1173 = vset.pattern.permute.xlu0 %v1264_v39 }
 0x6a6   :  { %v774_v57 = vpop.permute.xlu0 %773 }
 0x713   :  { %v749_v58 = vpop.permute.xlu1 %748 }
 0x714   :  { %v751_v60 = vsel %vm745_vm9, %v749_v58, %v744_v59 }
 0x717   :  { %v756_v61 = vpop.permute.xlu0 %755 }
 0x718   :  { %v758_v62 = vsel %vm752_vm10, %v756_v61, %v751_v60  ;;  %v787_v63 = vpop.permute.xlu1 %786 }
 0x719   :  { %v764_v1 = vsel %vm759_vm11, %v762_v52, %v758_v62 }
 0x71a   :  { %v770_v2 = vsel %vm765_vm12, %v768_v54, %v764_v1 }
 0x71b   :  { %v776_v3 = vsel %vm771_vm13, %v774_v57, %v770_v2 }
 0x71c   :  { %v783_v4 = vsel %vm777_vm14, %v781_v56, %v776_v3  ;;  %v793_v5 = vpop.permute.xlu0 %792  ;;  %v800_v8 = vpop.permute.xlu1 %799 }
 0x71d   :  { %v789_v6 = vsel %vm784_vm15, %v787_v63, %v783_v4 }
 0x71e   :  { %v795_v7 = vsel %vm790_vm0, %v793_v5, %v789_v6 }
 0x71f   :  { %v802_v21 = vsel %vm796_vm1, %v800_v8, %v795_v7 }
 0x720   :  { %803 = vst [vmem:[%s1420_s3] sm:$0xff] %v802_v21 }
 0x721   :  { %808 = vsyncpa [#allocation3], 1 }
 0x722   :  { %809 = vsyncpa [#allocation5], 1 }

</bundles_post_ra>
